<compile_context>
chip_gen: v5e
topology: v5e:2x2
jax: 0.10.0
libtpu: 0.0.40
codegen_flags: <defaults>
</compile_context>

<pallas_src>
import numpy as np
import jax
import jax.numpy as jnp
from jax import lax
from jax.experimental import pallas as pl
from jax.experimental.pallas import tpu as pltpu

EPS = 1e-5
LANE = 128


def _round_up(x, m):
    return (x + m - 1) // m * m


def _vmem_capacity_bytes():
    try:
        return int(pltpu.get_tpu_info().vmem_capacity_bytes)
    except Exception:
        return 64 * 1024 * 1024  # conservative (v7x-sized) fallback


def _compiler_params(vmem_limit_bytes):
    # row-grid axis is fully independent per tile -> "parallel" (megacore on v7x)
    return pltpu.CompilerParams(dimension_semantics=("parallel",),
                                vmem_limit_bytes=vmem_limit_bytes)


def _choose_tiles(M, nsample, c_max_p, max_tile_rows=None):
    """Generation-aware row tiling + VMEM-footprint-derived scoped limit."""
    cap = _vmem_capacity_bytes()
    if max_tile_rows is None:
        # bf16 activation tiles are cheap; go bigger on 128 MiB parts (v5e/v6e) than v7x
        max_tile_rows = 16384 if cap >= 100 * 1024 * 1024 else 8192
    tile_m = max(16, (max_tile_rows // max(nsample, 1)) // 16 * 16)  # whole groups, bf16-sublane aligned
    tile_m = min(tile_m, _round_up(M, 16))
    num_tiles = -(-M // tile_m)
    if num_tiles > 1 and num_tiles % 2 == 1:
        # keep the "parallel" row axis splittable across v7x's two TensorCores
        tile_m_even = max(16, _round_up(-(-M // (num_tiles + 1)), 16))
        nt = -(-M // tile_m_even)
        if nt % 2 == 0:
            tile_m, num_tiles = tile_m_even, nt
        else:
            num_tiles += 1                        # one extra, fully masked tile
    M_pad = tile_m * num_tiles
    tile_rows = tile_m * nsample
    # actual double-buffered block footprint (+ headroom), not a blanket cap//2
    need = (2 * tile_rows * c_max_p * 2           # activation in, 2 buffers, bf16
            + 2 * tile_rows * c_max_p * 2         # activation out, 2 buffers, bf16
            + c_max_p * c_max_p * 2               # resident weight
            + 2 * tile_m * c_max_p * 4            # pool output, f32
            + (2 << 20))                          # stats/partials/compiler scratch
    vmem_limit = int(min(max(2 * need, 16 << 20), cap - (8 << 20)))
    return tile_m, M_pad, num_tiles, vmem_limit


# ---------------------------------------------------------------------------
# Pallas kernels
# ---------------------------------------------------------------------------
def _make_layer_kernel(apply_bn, masked, tile_rows, valid_rows):
    """[BN(prev stats) -> ReLU ->] [mask pad rows ->] 1x1 conv (MXU) -> partial BN stats."""
    def kernel(x_ref, w_ref, stats_ref, y_ref, part_ref):
        x = x_ref[...]                                        # (tile_rows, Cin) bf16
        if apply_bn:
            x = x.astype(jnp.float32)
            mean = stats_ref[0:1, :]                          # (1, Cin)
            inv_std = stats_ref[1:2, :]
            x = jnp.maximum((x - mean) * inv_std, 0.0)        # BN -> ReLU of prev layer
        if masked:
            # zero rows that only exist due to group padding so they pollute neither
            # this layer's batch statistics nor the downstream max-pool
            row = (pl.program_id(0) * tile_rows
                   + lax.broadcasted_iota(jnp.int32, (tile_rows, 1), 0))
            x = jnp.where(row < valid_rows, x, 0.0)
        y = jnp.dot(x.astype(jnp.bfloat16), w_ref[...],
                    preferred_element_type=jnp.float32)       # MXU, f32 accumulate
        # partial BN stats from the f32 accumulator (before the bf16 storage cast);
        # two direct row stores, no concat/relayout in the epilogue.
        part_ref[0, 0:1, :] = jnp.sum(y, axis=0, keepdims=True)
        part_ref[0, 1:2, :] = jnp.sum(y * y, axis=0, keepdims=True)
        y_ref[...] = y.astype(y_ref.dtype)                    # bf16 activation store
    return kernel


def _mlp_layer(x, w_bf16, stats, *, apply_bn, masked, valid_rows,
               tile_rows, num_tiles, vmem_limit):
    rows_pad, cin = x.shape
    cout_p = w_bf16.shape[1]
    kernel = _make_layer_kernel(apply_bn, masked, tile_rows, valid_rows)
    y, parts = pl.pallas_call(
        kernel,
        out_shape=(jax.ShapeDtypeStruct((rows_pad, cout_p), jnp.bfloat16),
                   jax.ShapeDtypeStruct((num_tiles, 2, cout_p), jnp.float32)),
        grid=(num_tiles,),
        in_specs=[pl.BlockSpec((tile_rows, cin), lambda i: (i, 0)),      # activations, tiled
                  pl.BlockSpec((cin, cout_p), lambda i: (0, 0)),         # weight, resident
                  pl.BlockSpec((2, stats.shape[1]), lambda i: (0, 0))],  # prev BN stats
        out_specs=(pl.BlockSpec((tile_rows, cout_p), lambda i: (i, 0)),
                   pl.BlockSpec((1, 2, cout_p), lambda i: (i, 0, 0))),
        compiler_params=_compiler_params(vmem_limit),
    )(x, w_bf16, stats)
    # exact full-batch BatchNorm statistics (training mode, biased variance).
    # TODO(synk): E[y^2]-E[y]^2 in f32 can cancel for extreme mean/std ratios; switch to
    # mean-shifted per-tile partials (Welford merge) if that ever bites.
    tot = jnp.sum(parts, axis=0)                              # (2, cout_p)
    mean = tot[0] / float(valid_rows)
    var = tot[1] / float(valid_rows) - mean * mean
    inv_std = lax.rsqrt(jnp.maximum(var, 0.0) + EPS)
    new_stats = jnp.stack([mean, inv_std], axis=0)            # (2, cout_p)
    return y, new_stats


def _pool_kernel(y_ref, stats_ref, o_ref):
    """BN(last-layer stats) -> ReLU -> max over nsample (== F.max_pool2d over samples)."""
    y = y_ref[...].astype(jnp.float32)                        # (tile_m, nsample, C_p)
    mean = stats_ref[0:1, :]                                  # (1, C_p), broadcasts
    inv_std = stats_ref[1:2, :]
    y = jnp.maximum((y - mean) * inv_std, 0.0)
    o_ref[...] = jnp.max(y, axis=1)                           # (tile_m, C_p)


def _bn_relu_maxpool(y, stats, *, M_pad, nsample, tile_m, num_tiles, vmem_limit):
    c = y.shape[-1]
    y3 = y.reshape(M_pad, nsample, c)                         # leading-dim split: free
    return pl.pallas_call(
        _pool_kernel,
        out_shape=jax.ShapeDtypeStruct((M_pad, c), jnp.float32),
        grid=(num_tiles,),
        in_specs=[pl.BlockSpec((tile_m, nsample, c), lambda i: (i, 0, 0)),
                  pl.BlockSpec((2, c), lambda i: (0, 0))],
        out_specs=pl.BlockSpec((tile_m, c), lambda i: (i, 0)),
        compiler_params=_compiler_params(vmem_limit),
    )(y3, stats)


def _scale_mlp_pool(grouped, ws_bf16, *, M, nsample, tile_m, M_pad, num_tiles, vmem_limit):
    """Whole per-scale pointnet: bf16 cast + group pad -> L layer kernels -> pool kernel."""
    c0 = grouped.shape[-1]
    g = jnp.pad(grouped.astype(jnp.bfloat16), ((0, M_pad - M), (0, 0), (0, 0)))
    x = g.reshape(M_pad * nsample, c0)                        # keep the real 3+C channels
    tile_rows = tile_m * nsample
    valid_rows = M * nsample
    stats = jnp.zeros((2, c0), jnp.float32)                   # unused for first layer
    for li, w in enumerate(ws_bf16):
        x, stats = _mlp_layer(
            x, w, stats,
            apply_bn=(li > 0),
            masked=(li > 0 and M_pad != M),
            valid_rows=valid_rows, tile_rows=tile_rows,
            num_tiles=num_tiles, vmem_limit=vmem_limit)
    pooled = _bn_relu_maxpool(x, stats, M_pad=M_pad, nsample=nsample,
                              tile_m=tile_m, num_tiles=num_tiles, vmem_limit=vmem_limit)
    return pooled[:M]                                         # strip group padding


# ---------------------------------------------------------------------------
# QueryAndGroup glue (ball query is ragged / data-dependent)
# ---------------------------------------------------------------------------
def query_and_group(d2, same_batch, xyz, new_xyz, features, radius, nsample):
    # TODO(synk): ball-query neighbor search is a ragged, data-dependent op; kept as XLA
    # gather glue (one stable argsort per scale over the shared distance matrix).
    valid = (d2 < radius * radius) & same_batch
    cnt = jnp.sum(valid, axis=1)                                        # (M,)
    order = jnp.argsort(jnp.logical_not(valid), axis=1, stable=True)    # valid cols first
    idx = order[:, :nsample]                                            # (M, nsample)
    first = idx[:, :1]
    slot = jnp.arange(nsample)[None, :]
    idx = jnp.where(slot < cnt[:, None], idx, first)                    # repeat-fill w/ first
    empty = cnt == 0
    idx = jnp.where(empty[:, None], 0, idx)
    grouped_xyz = xyz[idx] - new_xyz[:, None, :]                        # (M, nsample, 3)
    grouped_feat = features[idx]                                        # (M, nsample, C)
    grouped_xyz = jnp.where(empty[:, None, None], 0.0, grouped_xyz)     # empty balls -> 0
    grouped_feat = jnp.where(empty[:, None, None], 0.0, grouped_feat)
    return jnp.concatenate([grouped_xyz, grouped_feat], axis=-1)        # (M, nsample, 3+C)


# ---------------------------------------------------------------------------
# Parameters (Conv2d 1x1, no bias, kaiming_normal; BN gamma=1 beta=0 per init_weights)
# ---------------------------------------------------------------------------
def init_params(key, mlps):
    ws = []
    for widths in mlps:
        layer_ws = []
        for li, (cin, cout) in enumerate(zip(widths[:-1], widths[1:])):
            key, sk = jax.random.split(key)
            w = jax.random.normal(sk, (cin, cout), jnp.float32) * float(np.sqrt(2.0 / cin))
            cin_p = cin if li == 0 else _round_up(cin, LANE)   # layer 0 keeps the real 3+C
            cout_p = _round_up(cout, LANE)
            wp = jnp.zeros((cin_p, cout_p), jnp.float32).at[:cin, :cout].set(w)
            layer_ws.append(wp.astype(jnp.bfloat16))           # cast once, MXU-native
        ws.append(layer_ws)
    return {"ws": ws}


# ---------------------------------------------------------------------------
# Full forward
# ---------------------------------------------------------------------------
def stack_sa_msg_forward(params, xyz, xyz_bid, new_xyz, new_bid, features,
                         radii, nsamples, mlps, *, max_tile_rows=None):
    M = new_xyz.shape[0]
    # O(M*N) pairwise work shared by every scale (only the radius threshold differs)
    d2 = jnp.sum((new_xyz[:, None, :] - xyz[None, :, :]) ** 2, axis=-1)
    same_batch = new_bid[:, None] == xyz_bid[None, :]
    outs = []
    for k in range(len(radii)):
        nsample = nsamples[k]
        grouped = query_and_group(d2, same_batch, xyz, new_xyz, features,
                                  radii[k], nsample)
        c_max_p = max(_round_up(w, LANE) for w in mlps[k][1:])
        tile_m, M_pad, num_tiles, vmem_limit = _choose_tiles(M, nsample, c_max_p,
                                                             max_tile_rows)
        pooled = _scale_mlp_pool(grouped, params["ws"][k],
                                 M=M, nsample=nsample, tile_m=tile_m,
                                 M_pad=M_pad, num_tiles=num_tiles,
                                 vmem_limit=vmem_limit)
        outs.append(pooled[:, :mlps[k][-1]])                  # strip channel padding
    return new_xyz, jnp.concatenate(outs, axis=1)


# ---------------------------------------------------------------------------
# Pure-JAX f32 reference (mirrors the PyTorch module, training-mode BN)
# ---------------------------------------------------------------------------
def _reference_forward(params, xyz, xyz_bid, new_xyz, new_bid, features,
                       radii, nsamples, mlps):
    M = new_xyz.shape[0]
    d2 = jnp.sum((new_xyz[:, None, :] - xyz[None, :, :]) ** 2, axis=-1)
    same_batch = new_bid[:, None] == xyz_bid[None, :]
    outs = []
    for k in range(len(radii)):
        ns = nsamples[k]
        grouped = query_and_group(d2, same_batch, xyz, new_xyz, features, radii[k], ns)
        x = grouped.reshape(M * ns, -1)
        for w in params["ws"][k]:
            y = x @ w.astype(jnp.float32)
            mean = jnp.mean(y, axis=0)
            var = jnp.var(y, axis=0)
            x = jnp.maximum((y - mean) * lax.rsqrt(var + EPS), 0.0)
        outs.append(jnp.max(x.reshape(M, ns, -1), axis=1)[:, :mlps[k][-1]])
    return jnp.concatenate(outs, axis=1)


# ---------------------------------------------------------------------------
if __name__ == "__main__":
    key = jax.random.PRNGKey(0)
    B, N_per, M_per, C = 2, 64, 28, 16
    radii = [0.5, 1.0]
    nsamples = [8, 16]
    # use_xyz=True -> first MLP width is C + 3
    mlps = [[C + 3, 16, 32], [C + 3, 16, 32]]

    k_xyz, k_feat, k_par = jax.random.split(key, 3)
    xyz = jax.random.uniform(k_xyz, (B * N_per, 3), jnp.float32)
    features = jax.random.normal(k_feat, (B * N_per, C), jnp.float32)
    xyz_batch_cnt = np.array([N_per] * B, np.int32)
    new_idx = np.concatenate([np.arange(M_per) + b * N_per for b in range(B)])
    new_xyz = xyz[new_idx]
    new_xyz_batch_cnt = np.array([M_per] * B, np.int32)

    xyz_bid = jnp.asarray(np.repeat(np.arange(B), xyz_batch_cnt), jnp.int32)
    new_bid = jnp.asarray(np.repeat(np.arange(B), new_xyz_batch_cnt), jnp.int32)

    params = init_params(k_par, mlps)

    # max_tile_rows=256 only to exercise the multi-tile pipeline at these toy sizes;
    # leave it at None in real use (VMEM-capacity-aware default of 8-16K flattened rows).
    out_xyz, out_feat = stack_sa_msg_forward(
        params, xyz, xyz_bid, new_xyz, new_bid, features,
        radii, nsamples, mlps, max_tile_rows=256)
    jax.block_until_ready(out_feat)

    M_total = B * M_per
    assert out_xyz.shape == (M_total, 3)
    assert out_feat.shape == (M_total, sum(m[-1] for m in mlps))
    assert bool(jnp.all(jnp.isfinite(out_feat)))

    # loose tolerance: kernel intentionally uses bf16 matmul operands and bf16
    # inter-layer activation storage, while the reference is end-to-end f32.
    ref = _reference_forward(params, xyz, xyz_bid, new_xyz, new_bid, features,
                             radii, nsamples, mlps)
    max_err = float(jnp.max(jnp.abs(out_feat - ref)))
    assert max_err < 0.5, f"max abs err vs f32 reference too large: {max_err}"

    print("KERNEL_OK")
</pallas_src>

<mosaic_0001>
module attributes {stable_mosaic.version = 11 : i64} {
  func.func @kernel(%arg0: i32, %arg1: memref<256x19xbf16, #tpu.memory_space<vmem>>, %arg2: memref<19x128xbf16, #tpu.memory_space<vmem>>, %arg3: memref<2x19xf32, #tpu.memory_space<vmem>>, %arg4: memref<256x128xbf16, #tpu.memory_space<vmem>>, %arg5: memref<1x2x128xf32, #tpu.memory_space<vmem>>) attributes {dimension_semantics = [#tpu.dimension_semantics<parallel>], iteration_bounds = array<i64: 2>, scalar_prefetch = 0 : i64, scratch_operands = 0 : i64, tpu.core_type = #tpu.core_type<tc>, window_params = [{transform_indices = @transform_0, window_bounds = array<i64: 256, 19>}, {pipeline_mode = #tpu.pipeline_mode<synchronous>, transform_indices = @transform_1, window_bounds = array<i64: 19, 128>}, {pipeline_mode = #tpu.pipeline_mode<synchronous>, transform_indices = @transform_2, window_bounds = array<i64: 2, 19>}, {transform_indices = @transform_3, window_bounds = array<i64: 256, 128>}, {transform_indices = @transform_4, window_bounds = array<i64: 1, 2, 128>}]} {
    %c0 = arith.constant 0 : index
    %c0_0 = arith.constant 0 : index
    %0 = vector.load %arg1[%c0, %c0_0] : memref<256x19xbf16, #tpu.memory_space<vmem>>, vector<256x19xbf16>
    %c0_1 = arith.constant 0 : index
    %c0_2 = arith.constant 0 : index
    %1 = vector.load %arg2[%c0_1, %c0_2] : memref<19x128xbf16, #tpu.memory_space<vmem>>, vector<19x128xbf16>
    %cst = arith.constant dense<0.000000e+00> : vector<256x128xf32>
    %2 = tpu.matmul %0, %1, %cst {dimension_numbers = #tpu.dot_dimension_numbers<[1], [0], [0], [1], [0, 0, 1, 1], [], []>} : vector<256x19xbf16>, vector<19x128xbf16>, vector<256x128xf32> -> vector<256x128xf32>
    %cst_3 = arith.constant dense<0.000000e+00> : vector<128xf32>
    %3 = vector.multi_reduction <add>, %2, %cst_3 [0] : vector<256x128xf32> to vector<128xf32>
    %4 = vector.shape_cast %3 : vector<128xf32> to vector<1x128xf32>
    %c0_4 = arith.constant 0 : index
    %c0_5 = arith.constant 0 : index
    %c0_6 = arith.constant 0 : index
    %5 = vector.load %arg5[%c0_4, %c0_5, %c0_6] : memref<1x2x128xf32, #tpu.memory_space<vmem>>, vector<1x1x128xf32>
    %6 = vector.shape_cast %5 : vector<1x1x128xf32> to vector<1x128xf32>
    %7 = vector.shape_cast %4 : vector<1x128xf32> to vector<1x1x128xf32>
    tpu.vector_store %arg5[%c0_4, %c0_5, %c0_6], %7 {strides = array<i32>} : memref<1x2x128xf32, #tpu.memory_space<vmem>>, vector<1x1x128xf32>,
    %8 = arith.mulf %2, %2 : vector<256x128xf32>
    %cst_7 = arith.constant dense<0.000000e+00> : vector<128xf32>
    %9 = vector.multi_reduction <add>, %8, %cst_7 [0] : vector<256x128xf32> to vector<128xf32>
    %10 = vector.shape_cast %9 : vector<128xf32> to vector<1x128xf32>
    %c0_8 = arith.constant 0 : index
    %c1 = arith.constant 1 : index
    %c0_9 = arith.constant 0 : index
    %11 = vector.load %arg5[%c0_8, %c1, %c0_9] : memref<1x2x128xf32, #tpu.memory_space<vmem>>, vector<1x1x128xf32>
    %12 = vector.shape_cast %11 : vector<1x1x128xf32> to vector<1x128xf32>
    %13 = vector.shape_cast %10 : vector<1x128xf32> to vector<1x1x128xf32>
    tpu.vector_store %arg5[%c0_8, %c1, %c0_9], %13 {strides = array<i32>} : memref<1x2x128xf32, #tpu.memory_space<vmem>>, vector<1x1x128xf32>,
    %14 = arith.truncf %2 : vector<256x128xf32> to vector<256x128xbf16>
    %c0_10 = arith.constant 0 : index
    %c0_11 = arith.constant 0 : index
    %15 = vector.load %arg4[%c0_10, %c0_11] : memref<256x128xbf16, #tpu.memory_space<vmem>>, vector<256x128xbf16>
    tpu.vector_store %arg4[%c0_10, %c0_11], %14 {strides = array<i32>} : memref<256x128xbf16, #tpu.memory_space<vmem>>, vector<256x128xbf16>,
    return
  }
  func.func @transform_0(%arg0: i32) -> (i32, i32) {
    %c0_i32 = arith.constant 0 : i32
    %c0_i32_0 = arith.constant 0 : i32
    return %arg0, %c0_i32 : i32, i32
  }
  func.func @transform_1(%arg0: i32) -> (i32, i32) {
    %c0_i32 = arith.constant 0 : i32
    %c0_i32_0 = arith.constant 0 : i32
    %c0_i32_1 = arith.constant 0 : i32
    return %c0_i32, %c0_i32_0 : i32, i32
  }
  func.func @transform_2(%arg0: i32) -> (i32, i32) {
    %c0_i32 = arith.constant 0 : i32
    %c0_i32_0 = arith.constant 0 : i32
    %c0_i32_1 = arith.constant 0 : i32
    return %c0_i32, %c0_i32_0 : i32, i32
  }
  func.func @transform_3(%arg0: i32) -> (i32, i32) {
    %c0_i32 = arith.constant 0 : i32
    %c0_i32_0 = arith.constant 0 : i32
    return %arg0, %c0_i32 : i32, i32
  }
  func.func @transform_4(%arg0: i32) -> (i32, i32, i32) {
    %c0_i32 = arith.constant 0 : i32
    %c0_i32_0 = arith.constant 0 : i32
    %c0_i32_1 = arith.constant 0 : i32
    return %arg0, %c0_i32, %c0_i32_0 : i32, i32, i32
  }
}

</mosaic_0001>

<bundles_post_ra>
// kernel: tpu_custom_call.1
= control target key start
LH: loop header
LB: loop body
LE: loop exit
PB: predicated region body
PF: predicated region fallthrough
CT: control target
= control target key end

     0   :  { %10 = vsyncpa [#allocation3], 0  ;;  %s1469_s0 = inlined_call_operand.vmem [shape: bf16[512,19], index: 0, kind: input, shape index: {}]   ;;  %s1470_s1 = inlined_call_operand.vmem [shape: bf16[19,128], index: 1, kind: input, shape index: {}]   ;;  %s1471_s2 = inlined_call_operand.vmem [shape: f32[2,19], index: 2, kind: input, shape index: {}]   ;;  %s1472_s3 = inlined_call_operand.hbm [shape: bf16[512,128], index: 3, kind: output, shape index: {0}]   ;;  %s1473_s4 = inlined_call_operand.hbm [shape: f32[2,2,128], index: 4, kind: output, shape index: {1}]  }
   0x1   :  { %12 = vsyncpa [#allocation3 + $0x1], 0 }
   0x2   :  { %13 = vsyncpa [#allocation5], 0 }
   0x3   :  { %15 = vsyncpa [#allocation5 + $0x1], 0  ;;  %s1171_s15 = smov 0   ;;  %s1173_s16 = smov 0  }
   0x4   :  { %s1175_s17 = smov 0   ;;  %s1177_s18 = smov 0  }
   0x5 LB: > { %s1192_s2 = sadd.s32 4294967295, %s1141_s18   ;;  %s782_s19 = sadd.s32 4294967294, %s1141_s18   ;;  %s1141_s18 = sphi %s1177_s18, %s1479_s18   ;;  %s1137_s17 = sphi %s1175_s17, %s1478_s17   ;;  %s1133_s16 = sphi %s1173_s16, %s1477_s16   ;;  %s1129_s15 = sphi %s1171_s15, %s1476_s15  }
   0x6   : > { %s1196_s20 = sadd.s32 1, %s1141_s18   ;;  %s96_s21 = sadd.s32 1, %s1137_s17 }
   0x7   : > { %s93_s22 = ssub.s32 %s1141_s18, %s1196_s20  ;;  %p106_p0 = scmp.ne.s32.totalorder %s1137_s17, %s1133_s16 }
   0x8   : > { %p94_p1 = scmp.eq.s32.totalorder %s93_s22, 0  ;;  %p107_p2 = scmp.eq.s32.totalorder %s1192_s2, 1 }
   0x9   : > { %p112_p3 = scmp.ne.s32.totalorder %s1133_s16, %s1129_s15  ;;  %p113_p4 = scmp.eq.s32.totalorder %s782_s19, 1 }
   0xa   : > { %s1207_s23 = scalar_select %p94_p1, %s1137_s17, %s96_s21  }
   0xb   : > { %p1209_p5 = por %p107_p2, %p106_p0  ;;  %p1213_p6 = por %p113_p4, %p112_p3 }
   0xc   : > { %p785_p7 = scmp.ge.s32.totalorder %s1141_s18, 1  ;;  %p172_p8 = scmp.lt.s32.totalorder %s1141_s18, 3 }
   0xe   : > { %p173_p9 = pnand %p785_p7, %p172_p8 }
   0xf   : > { %s788_s28 = sshll.u32 (!%p173_p9), %s1192_s2, 5  ;;  %s1266_s9 = sand.u32 (!%p173_p9), 1, %s1133_s16  }
  0x10   : > { %176 = sbr.rel (%p173_p9) target bundleno = 284 (0x11c), region = 32  ;;  %p204_p10 = scmp.lt.s32.totalorder (!%p173_p9), %s788_s28, 63 }
  0x11   : > { %s786_s10 = sshll.u32 (!%p173_p9), %s1266_s9, 7  ;;  %s898_s12 = sshll.u32 (!%p173_p9), %s1192_s2, 7 }
  0x12   : > { %s1277_s11 = scalar_lea.vmem (!%p173_p9), [#allocation2], %s786_s10  ;;  %s669_s19 = scalar_lea.hbm (!%p173_p9), %s1472_s3, %s898_s12 }
  0x13   : > { %s670_s21 = sshll.u32 (!%p173_p9), %s1277_s11, 4  ;;  %s672_s22 = sshll.u32 (!%p173_p9), %s669_s19, 4  ;;  %s1364_s21 = int_to_ptr.vmem [resolvable:$true] %s670_s21  ;;  %s673_s22 = int_to_ptr.hbm [resolvable:$true] %s672_s22 }
  0x14   : > { %s653_s26 = scalar_lea.sflag (!%p173_p9), [#allocation3], %s1266_s9  ;;  %s1061_s27 = sshra.s32 (!%p173_p9), %s673_s22, 4  ;;  %s1062_s27 = int_to_ptr.hbm [resolvable:$true] %s1061_s27 }
  0x15   : > { %v245_v0 = vld [vmem:[%s1470_s1 + $0x8] sm:$0x3]  ;;  %vm384_vm0 = vcmask 1040384   ;;  %vm385_vm1 = vcmask 1041408   ;;  %v1143_v2 = vmov 65535   ;;  %s1481_s28 = smov (!%p204_p10, %s788_s28), 63  ;;  %p1068_p0 = scmp.lt.s32.totalorder %s1062_s27, %s1472_s3 }
  0x16   : > { %v331_v1 = vunpack.c.l.b16 %v245_v0  ;;  %v386_v3 = vsel %vm384_vm0, 4294967295, %v1143_v2  ;;  %s789_s29 = sshll.u32 %s1481_s28, 2  ;;  %v897_v7 = vld [vmem:[%s1470_s1] sm:$0xff]  ;;  %vm335_vm2 = vcmask 154624   ;;  %s1063_s28 = scalar_lea.hbm %s1062_s27, 128 }
  0x17   : > { %v387_v4 = vsel %vm385_vm1, %v386_v3, 0  ;;  %s1229_s8 = scalar_lea.vmem %s1469_s0, %s789_s29  ;;  %p1064_p11 = scmp.ne.s32.totalorder %s1062_s27, %s1063_s28 }
  0x18   : > { %v333_v5 = vpack.c.b16 %v331_v1, %v331_v1  ;;  %v881_v8 = vld [vmem:[%s1229_s8] sm:$0xff]  ;;  %v882_v12 = vld [vmem:[%s1229_s8 + $0x8] sm:$0xff]  ;;  %v883_v16 = vld [vmem:[%s1229_s8 + $0x10] sm:$0xff]  ;;  %s1067_s5 = scalar_lea.hbm %s1472_s3, 256 }
  0x19   : > { %v885_v9 = vld [vmem:[%s1229_s8 + $0x20] sm:$0xff]  ;;  %v886_v13 = vld [vmem:[%s1229_s8 + $0x28] sm:$0xff]  ;;  %v887_v17 = vld [vmem:[%s1229_s8 + $0x30] sm:$0xff]  ;;  %p1065_p12 = pnand %p1064_p11, %p1209_p5  ;;  %p1069_p1 = scmp.lt.s32.totalorder %s1067_s5, %s1063_s28 }
  0x1a   : > { %v389_v6 = vand.u32 %v387_v4, %v333_v5  ;;  %v889_v10 = vld [vmem:[%s1229_s8 + $0x40] sm:$0xff]  ;;  %v890_v14 = vld [vmem:[%s1229_s8 + $0x48] sm:$0xff]  ;;  %v891_v18 = vld [vmem:[%s1229_s8 + $0x50] sm:$0xff] }
  0x1b   : > { %v893_v11 = vld [vmem:[%s1229_s8 + $0x60] sm:$0xff]  ;;  %v894_v15 = vld [vmem:[%s1229_s8 + $0x68] sm:$0xff]  ;;  %v895_v19 = vld [vmem:[%s1229_s8 + $0x70] sm:$0xff]  ;;  %p1066_p13 = pneg %p1065_p12  ;;  %p1070_p2 = por %p1069_p1, %p1068_p0 }
  0x1c   : > { %397 = vmatpush.bf16.msra.mxu0 %v389_v6  ;;  %994 = vmatpush.bf16.msra.mxu1 %v389_v6  ;;  %v884_v20 = vld [vmem:[%s1229_s8 + $0x18] sm:$0xff] }
  0x1d   : > { %995 = vmatpush.bf16.msra.mxu2 %v389_v6  ;;  %996 = vmatpush.bf16.msra.mxu3 %v389_v6  ;;  %v888_v21 = vld [vmem:[%s1229_s8 + $0x38] sm:$0xff]  ;;  %p1071_p3 = pnand %p1070_p2, %p1066_p13 }
  0x1e   : > { %v892_v22 = vld [vmem:[%s1229_s8 + $0x58] sm:$0xff] }
  0x1f   : > { %v896_v23 = vld [vmem:[%s1229_s8 + $0x78] sm:$0xff] }
  0x20   : > { %398 = vmatpush.bf16.msra.mxu0 %v897_v7  ;;  %997 = vmatpush.bf16.msra.mxu1 %v897_v7 }
  0x21   : > { %998 = vmatpush.bf16.msra.mxu2 %v897_v7  ;;  %999 = vmatpush.bf16.msra.mxu3 %v897_v7 }
  0x23   : > { %858 = vmatmul.msk.bf16.vlgmr.msra.gmra.mxu0 %vm335_vm2, %v881_v8  ;;  %862 = vmatmul.msk.bf16.vlgmr.msra.gmra.mxu1 %vm335_vm2, %v885_v9 }
  0x24   : > { %866 = vmatmul.msk.bf16.vlgmr.msra.gmra.mxu2 %vm335_vm2, %v889_v10  ;;  %870 = vmatmul.msk.bf16.vlgmr.msra.gmra.mxu3 %vm335_vm2, %v893_v11 }
  0x33   : > { %859 = vmatmul.msk.bf16.gmra.mxu0 %vm335_vm2, %v882_v12  ;;  %863 = vmatmul.msk.bf16.gmra.mxu1 %vm335_vm2, %v886_v13 }
  0x34   : > { %867 = vmatmul.msk.bf16.gmra.mxu2 %vm335_vm2, %v890_v14  ;;  %871 = vmatmul.msk.bf16.gmra.mxu3 %vm335_vm2, %v894_v15 }
  0x43   : > { %860 = vmatmul.msk.bf16.gmra.mxu0 %vm335_vm2, %v883_v16  ;;  %864 = vmatmul.msk.bf16.gmra.mxu1 %vm335_vm2, %v887_v17 }
  0x44   : > { %868 = vmatmul.msk.bf16.gmra.mxu2 %vm335_vm2, %v891_v18  ;;  %872 = vmatmul.msk.bf16.gmra.mxu3 %vm335_vm2, %v895_v19 }
  0x53   : > { %861 = vmatmul.msk.bf16.gmra.mxu0 %vm335_vm2, %v884_v20  ;;  %865 = vmatmul.msk.bf16.gmra.mxu1 %vm335_vm2, %v888_v21 }
  0x54   : > { %869 = vmatmul.msk.bf16.gmra.mxu2 %vm335_vm2, %v892_v22  ;;  %873 = vmatmul.msk.bf16.gmra.mxu3 %vm335_vm2, %v896_v23 }
  0xa0   : > { %v400_v24 = vpop.f32.mrf.mxu0  ;;  %v1263_v25 = vpop.f32.mrf.mxu1 }
  0xa1   : > { %v518_v57 = vmul.f32 %v400_v24, %v400_v24 }
  0xa7   : > { %v1269_v26 = vpop.f32.mrf.mxu2  ;;  %v1273_v30 = vpop.f32.mrf.mxu3 }
  0xa8   : > { %v402_v27 = vpop.f32.mrf.mxu0  ;;  %v1271_v28 = vpop.f32.mrf.mxu1 }
  0xa9   : > { %v902_v29 = vpack.c.bf16 %v402_v27, %v400_v24  ;;  %v922_v31 = vpack.c.bf16 %v1271_v28, %v1263_v25  ;;  %v519_v56 = vmul.f32 %v402_v27, %v402_v27  ;;  %v480_v58 = vadd.f32 %v402_v27, %v400_v24 }
  0xaa   : > { %v526_v27 = vmul.f32 %v1263_v25, %v1263_v25 }
  0xab   : > { %903 = vst [vmem:[%s1277_s11] sm:$0xff] %v902_v29   ;;  %v550_v60 = vadd.f32 %v519_v56, %v518_v57 }
  0xac   : > { %982 = vst [vmem:[%s1277_s11 + $0x20] sm:$0xff] %v922_v31  }
  0xaf   : > { %v1281_v32 = vpop.f32.mrf.mxu2  ;;  %v1287_v36 = vpop.f32.mrf.mxu3 }
  0xb0   : > { %v405_v33 = vpop.f32.mrf.mxu0  ;;  %v1283_v34 = vpop.f32.mrf.mxu1  ;;  %v942_v35 = vpack.c.bf16 %v1281_v32, %v1269_v26  ;;  %v962_v37 = vpack.c.bf16 %v1287_v36, %v1273_v30 }
  0xb1   : > { %v520_v59 = vmul.f32 %v405_v33, %v405_v33  ;;  %v481_v61 = vadd.f32 %v480_v58, %v405_v33 }
  0xb2   : > { %986 = vst [vmem:[%s1277_s11 + $0x40] sm:$0xff] %v942_v35  }
  0xb3   : > { %990 = vst [vmem:[%s1277_s11 + $0x60] sm:$0xff] %v962_v37   ;;  %v551_v3 = vadd.f32 %v550_v60, %v520_v59 }
  0xb7   : > { %v1293_v38 = vpop.f32.mrf.mxu2  ;;  %v1297_v42 = vpop.f32.mrf.mxu3 }
  0xb8   : > { %v407_v39 = vpop.f32.mrf.mxu0  ;;  %v1295_v40 = vpop.f32.mrf.mxu1 }
  0xb9   : > { %v907_v41 = vpack.c.bf16 %v407_v39, %v405_v33  ;;  %v927_v43 = vpack.c.bf16 %v1295_v40, %v1283_v34  ;;  %v521_v62 = vmul.f32 %v407_v39, %v407_v39  ;;  %v482_v4 = vadd.f32 %v481_v61, %v407_v39 }
  0xba   : > { %v527_v33 = vmul.f32 %v1271_v28, %v1271_v28  ;;  %v528_v39 = vmul.f32 %v1283_v34, %v1283_v34 }
  0xbb   : > { %979 = vst [vmem:[%s1277_s11 + $0x8] sm:$0xff] %v907_v41   ;;  %v552_v8 = vadd.f32 %v551_v3, %v521_v62 }
  0xbc   : > { %983 = vst [vmem:[%s1277_s11 + $0x28] sm:$0xff] %v927_v43  }
  0xbf   : > { %v1303_v44 = vpop.f32.mrf.mxu2  ;;  %v1309_v48 = vpop.f32.mrf.mxu3 }
  0xc0   : > { %v410_v45 = vpop.f32.mrf.mxu0  ;;  %v1305_v46 = vpop.f32.mrf.mxu1  ;;  %v947_v47 = vpack.c.bf16 %v1303_v44, %v1293_v38  ;;  %v967_v49 = vpack.c.bf16 %v1309_v48, %v1297_v42 }
  0xc1   : > { %v522_v5 = vmul.f32 %v410_v45, %v410_v45  ;;  %v483_v9 = vadd.f32 %v482_v4, %v410_v45 }
  0xc2   : > { %987 = vst [vmem:[%s1277_s11 + $0x48] sm:$0xff] %v947_v47   ;;  %v529_v47 = vmul.f32 %v1295_v40, %v1295_v40 }
  0xc3   : > { %991 = vst [vmem:[%s1277_s11 + $0x68] sm:$0xff] %v967_v49   ;;  %v553_v11 = vadd.f32 %v552_v8, %v522_v5 }
  0xc7   : > { %v1315_v50 = vpop.f32.mrf.mxu2  ;;  %v1319_v54 = vpop.f32.mrf.mxu3 }
  0xc8   : > { %v412_v51 = vpop.f32.mrf.mxu0  ;;  %v1317_v52 = vpop.f32.mrf.mxu1 }
  0xc9   : > { %v912_v53 = vpack.c.bf16 %v412_v51, %v410_v45  ;;  %v932_v55 = vpack.c.bf16 %v1317_v52, %v1305_v46  ;;  %v523_v10 = vmul.f32 %v412_v51, %v412_v51  ;;  %v484_v12 = vadd.f32 %v483_v9, %v412_v51 }
  0xcb   : > { %980 = vst [vmem:[%s1277_s11 + $0x10] sm:$0xff] %v912_v53   ;;  %v554_v14 = vadd.f32 %v553_v11, %v523_v10  ;;  %v530_v53 = vmul.f32 %v1305_v46, %v1305_v46 }
  0xcc   : > { %984 = vst [vmem:[%s1277_s11 + $0x30] sm:$0xff] %v932_v55  }
  0xcf   : > { %v1325_v63 = vpop.f32.mrf.mxu2  ;;  %v1331_v6 = vpop.f32.mrf.mxu3 }
  0xd0   : > { %v415_v0 = vpop.f32.mrf.mxu0  ;;  %v1327_v1 = vpop.f32.mrf.mxu1  ;;  %v952_v2 = vpack.c.bf16 %v1325_v63, %v1315_v50  ;;  %v972_v7 = vpack.c.bf16 %v1331_v6, %v1319_v54 }
  0xd1   : > { %v524_v13 = vmul.f32 %v415_v0, %v415_v0  ;;  %v485_v15 = vadd.f32 %v484_v12, %v415_v0 }
  0xd2   : > { %988 = vst [vmem:[%s1277_s11 + $0x50] sm:$0xff] %v952_v2  }
  0xd3   : > { %992 = vst [vmem:[%s1277_s11 + $0x70] sm:$0xff] %v972_v7   ;;  %v555_v19 = vadd.f32 %v554_v14, %v524_v13 }
  0xd7   : > { %v1337_v16 = vpop.f32.mrf.mxu2  ;;  %v1339_v23 = vpop.f32.mrf.mxu3 }
  0xd8   : > { %v417_v17 = vpop.f32.mrf.mxu0  ;;  %v437_v18 = vpop.f32.mrf.mxu1 }
  0xd9   : > { %v486_v20 = vadd.f32 %v485_v15, %v417_v17  ;;  %v525_v21 = vmul.f32 %v417_v17, %v417_v17  ;;  %v917_v22 = vpack.c.bf16 %v417_v17, %v415_v0  ;;  %v937_v24 = vpack.c.bf16 %v437_v18, %v1327_v1 }
  0xdb   : > { %v487_v29 = vadd.f32 %v486_v20, %v1263_v25  ;;  %v556_v31 = vadd.f32 %v555_v19, %v525_v21  ;;  %981 = vst [vmem:[%s1277_s11 + $0x18] sm:$0xff] %v917_v22  }
  0xdc   : > { %985 = vst [vmem:[%s1277_s11 + $0x38] sm:$0xff] %v937_v24  }
  0xdd   : > { %v488_v35 = vadd.f32 %v487_v29, %v1271_v28  ;;  %v557_v37 = vadd.f32 %v556_v31, %v526_v27 }
  0xdf   : > { %v489_v25 = vadd.f32 %v488_v35, %v1283_v34  ;;  %v558_v41 = vadd.f32 %v557_v37, %v527_v33  ;;  %v457_v43 = vpop.f32.mrf.mxu2  ;;  %v1362_v51 = vpop.f32.mrf.mxu3 }
  0xe0   : > { %v957_v45 = vpack.c.bf16 %v457_v43, %v1337_v16  ;;  %v977_v34 = vpack.c.bf16 %v1362_v51, %v1339_v23 }
  0xe1   : > { %v559_v49 = vadd.f32 %v558_v41, %v528_v39  ;;  %v490_v28 = vadd.f32 %v489_v25, %v1295_v40  ;;  %v531_v40 = vmul.f32 %v1317_v52, %v1317_v52 }
  0xe2   : > { %989 = vst [vmem:[%s1277_s11 + $0x58] sm:$0xff] %v957_v45  }
  0xe3   : > { %v491_v55 = vadd.f32 %v490_v28, %v1305_v46  ;;  %v560_v56 = vadd.f32 %v559_v49, %v529_v47  ;;  %993 = vst [vmem:[%s1277_s11 + $0x78] sm:$0xff] %v977_v34  }
  0xe5   : > { %v492_v57 = vadd.f32 %v491_v55, %v1317_v52  ;;  %v561_v58 = vadd.f32 %v560_v56, %v530_v53 }
  0xe6   : > { %1074 = shalt.err (!%p1071_p3)
}
  0xe7   : > { %s1144_s8 = smov 64   ;;  %s1145_s10 = smov 4   ;;  %v493_v46 = vadd.f32 %v492_v57, %v1327_v1  ;;  %v532_v52 = vmul.f32 %v1327_v1, %v1327_v1  ;;  %v562_v59 = vadd.f32 %v561_v58, %v531_v40  ;;  %v533_v62 = vmul.f32 %v437_v18, %v437_v18 }
  0xe8   : > { %1000 = dma.vmem_to_hbm [thread:$0]  (%p1209_p5), %s1364_s21, 2048, %s673_s22, %s653_s26, %s1144_s8, %s1144_s8, %s1145_s10   ;;  %v534_v0 = vmul.f32 %v1269_v26, %v1269_v26  ;;  %v535_v4 = vmul.f32 %v1281_v32, %v1281_v32  ;;  %v536_v8 = vmul.f32 %v1293_v38, %v1293_v38  ;;  %v537_v10 = vmul.f32 %v1303_v44, %v1303_v44 }
  0xe9   : > { %v563_v60 = vadd.f32 %v562_v59, %v532_v52  ;;  %v494_v61 = vadd.f32 %v493_v46, %v437_v18  ;;  %v539_v15 = vmul.f32 %v1325_v63, %v1325_v63  ;;  %v540_v19 = vmul.f32 %v1337_v16, %v1337_v16  ;;  %s787_s11 = sshll.u32 %s1266_s9, 1  ;;  %s878_s12 = sshll.u32 %s1192_s2, 1 }
  0xea   : > { %v541_v21 = vmul.f32 %v457_v43, %v457_v43  ;;  %v542_v22 = vmul.f32 %v1273_v30, %v1273_v30  ;;  %v543_v27 = vmul.f32 %v1287_v36, %v1287_v36  ;;  %v544_v31 = vmul.f32 %v1297_v42, %v1297_v42  ;;  %s685_s19 = scalar_lea.hbm %s1473_s4, %s878_s12  ;;  %s202_s21 = scalar_lea.vmem [#allocation4], %s787_s11 }
  0xeb   : > { %v495_v2 = vadd.f32 %v494_v61, %v1269_v26  ;;  %v564_v3 = vadd.f32 %v563_v60, %v533_v62  ;;  %v538_v26 = vmul.f32 %v1315_v50, %v1315_v50  ;;  %v545_v35 = vmul.f32 %v1309_v48, %v1309_v48  ;;  %s687_s22 = sshll.u32 %s202_s21, 4  ;;  %s689_s26 = sshll.u32 %s685_s19, 4  ;;  %s688_s22 = int_to_ptr.vmem [resolvable:$true] %s687_s22  ;;  %s690_s26 = int_to_ptr.hbm [resolvable:$true] %s689_s26 }
  0xec   : > { %s658_s2 = scalar_lea.sflag [#allocation5], %s1266_s9  ;;  %s1089_s27 = sshra.s32 %s690_s26, 4  ;;  %s1090_s27 = int_to_ptr.hbm [resolvable:$true] %s1089_s27 }
  0xed   : > { %v496_v5 = vadd.f32 %v495_v2, %v1281_v32  ;;  %v565_v7 = vadd.f32 %v564_v3, %v534_v0  ;;  %s1091_s28 = scalar_lea.hbm %s1090_s27, 2  ;;  %s1095_s5 = scalar_lea.hbm %s1473_s4, 4 }
  0xee   : > { %p1092_p4 = scmp.ne.s32.totalorder %s1090_s27, %s1091_s28  ;;  %p1096_p9 = scmp.lt.s32.totalorder %s1090_s27, %s1473_s4 }
  0xef   : > { %v497_v1 = vadd.f32 %v496_v5, %v1293_v38  ;;  %v566_v9 = vadd.f32 %v565_v7, %v535_v4  ;;  %p1097_p10 = scmp.lt.s32.totalorder %s1095_s5, %s1091_s28 }
  0xf0   : > { %p1093_p7 = pnand %p1092_p4, %p1209_p5 }
  0xf1   : > { %v567_v11 = vadd.f32 %v566_v9, %v536_v8  ;;  %v498_v12 = vadd.f32 %v497_v1, %v1303_v44  ;;  %p1098_p11 = por %p1097_p10, %p1096_p9 }
  0xf2   : > { %p1094_p8 = pneg %p1093_p7 }
  0xf3   : > { %v499_v13 = vadd.f32 %v498_v12, %v1315_v50  ;;  %v568_v14 = vadd.f32 %v567_v11, %v537_v10 }
  0xf4   : > { %p1099_p12 = pnand %p1098_p11, %p1094_p8 }
  0xf5   : > { %v500_v32 = vadd.f32 %v499_v13, %v1325_v63  ;;  %v569_v17 = vadd.f32 %v568_v14, %v538_v26 }
  0xf7   : > { %v570_v38 = vadd.f32 %v569_v17, %v539_v15  ;;  %v501_v18 = vadd.f32 %v500_v32, %v1337_v16 }
  0xf9   : > { %v571_v20 = vadd.f32 %v570_v38, %v540_v19  ;;  %v502_v44 = vadd.f32 %v501_v18, %v457_v43 }
  0xfb   : > { %v503_v50 = vadd.f32 %v502_v44, %v1273_v30  ;;  %v572_v24 = vadd.f32 %v571_v20, %v541_v21  ;;  %v546_v30 = vmul.f32 %v1319_v54, %v1319_v54 }
  0xfd   : > { %v504_v63 = vadd.f32 %v503_v50, %v1287_v36  ;;  %v573_v29 = vadd.f32 %v572_v24, %v542_v22 }
  0xff   : > { %v505_v16 = vadd.f32 %v504_v63, %v1297_v42  ;;  %v574_v33 = vadd.f32 %v573_v29, %v543_v27  ;;  %v547_v42 = vmul.f32 %v1331_v6, %v1331_v6 }
 0x101   : > { %v575_v37 = vadd.f32 %v574_v33, %v544_v31  ;;  %v506_v39 = vadd.f32 %v505_v16, %v1309_v48  ;;  %v548_v48 = vmul.f32 %v1339_v23, %v1339_v23 }
 0x103   : > { %v507_v25 = vadd.f32 %v506_v39, %v1319_v54  ;;  %v576_v36 = vadd.f32 %v575_v37, %v545_v35  ;;  %v549_v54 = vmul.f32 %v1362_v51, %v1362_v51 }
 0x105   : > { %v508_v41 = vadd.f32 %v507_v25, %v1331_v6  ;;  %v577_v43 = vadd.f32 %v576_v36, %v546_v30 }
 0x107   : > { %v578_v45 = vadd.f32 %v577_v43, %v547_v42  ;;  %v509_v47 = vadd.f32 %v508_v41, %v1339_v23 }
 0x109   : > { %v579_v49 = vadd.f32 %v578_v45, %v548_v48  ;;  %v510_v28 = vadd.f32 %v509_v47, %v1362_v51 }
 0x10b   : > { %v511_v34 = vrot.slane %v510_v28, 4  ;;  %v580_v53 = vadd.f32 %v579_v49, %v549_v54 }
 0x10d   : > { %v512_v55 = vadd.f32 %v511_v34, %v510_v28  ;;  %v581_v56 = vrot.slane %v580_v53, 4 }
 0x10f   : > { %v513_v6 = vrot.slane %v512_v55, 2  ;;  %v582_v40 = vadd.f32 %v581_v56, %v580_v53 }
 0x111   : > { %v514_v57 = vadd.f32 %v513_v6, %v512_v55  ;;  %v583_v58 = vrot.slane %v582_v40, 2 }
 0x113   : > { %v515_v23 = vrot.slane %v514_v57, 1  ;;  %v584_v46 = vadd.f32 %v583_v58, %v582_v40 }
 0x115   : > { %v516_v51 = vadd.f32 %v515_v23, %v514_v57  ;;  %v585_v52 = vrot.slane %v584_v46, 1 }
 0x117   : > { %517 = vst [vmem:[%s202_s21] sm:$0x1] %v516_v51  ;;  %v586_v59 = vadd.f32 %v585_v52, %v584_v46 }
 0x119   : > { %587 = vst [vmem:[%s202_s21 + $0x1] sm:$0x1] %v586_v59 }
 0x11a   : > { %1102 = shalt.err (!%p1099_p12)
}
 0x11b   : > { %1001 = dma.vmem_to_hbm [thread:$0]  (%p1209_p5), %s688_s22, 32, %s690_s26, %s658_s2  }
 0x11c PF: > { %p1011_p13 = scmp.ge.s32.totalorder %s1141_s18, 2  ;;  %s701_s9 = sand.u32 1, %s1129_s15  }
 0x11d   : > { %s702_s8 = scalar_lea.sflag [#allocation3], %s701_s9 }
 0x11e   : > { %p1005_p0 = pnand %p1011_p13, %p1213_p6 }
 0x120   : > { %p1006_p1 = pneg %p1005_p0 }
 0x122   : > { %1120 = dma.done.wait (%p1006_p1), %s702_s8, 2048  }
 0x123   : > { %1122 = vsyncadd (%p1006_p1), %s702_s8, 4294965248  ;;  %s712_s10 = scalar_lea.sflag [#allocation5], %s701_s9 }
 0x124   : > { %1124 = dma.done.wait (%p1006_p1), %s712_s10, 32  }
 0x125   : > { %1126 = vsyncadd (%p1006_p1), %s712_s10, 4294967264  ;;  %p18_p5 = scmp.ge.s32.totalorder %s1196_s20, 4   ;;  %s1476_s15 = smov %s1133_s16 }
 0x126   : > { %s1477_s16 = smov %s1137_s17  ;;  %s1478_s17 = smov %s1207_s23 }
 0x127   : > { %s1479_s18 = smov %s1196_s20  ;;  %20 = sbr.rel (!%p18_p5) target bundleno = 5 (0x5), region = 84 }
 0x12c   :  { %718 = vsyncpa [#allocation3], 1 }
 0x12d   :  { %720 = vsyncpa [#allocation3 + $0x1], 1 }
 0x12e   :  { %721 = vsyncpa [#allocation5], 1 }
 0x12f   :  { %723 = vsyncpa [#allocation5 + $0x1], 1 }

</bundles_post_ra>
